<compile_context>
chip_gen: v5e
topology: v5e:2x2
jax: 0.10.0
libtpu: 0.0.40
codegen_flags: <defaults>
</compile_context>

<pallas_src>
import jax
import jax.numpy as jnp
from jax.experimental import pallas as pl
from jax.experimental.pallas import tpu as pltpu


def _round_up(x, m):
    return ((x + m - 1) // m) * m


def _cdiv(a, b):
    return -(-a // b)


# ---------------------------------------------------------------------------
# Parameter packing — done ONCE at parameter-load time, not per forward call.
# ---------------------------------------------------------------------------
def pack_deepnet_params(params, in_dim):
    """Fold eval-mode BN into the following Linear, pad to lane width, stack.

    params: list of (W (din,dout), b (1,dout), bn_scale (1,dout), bn_shift (1,dout)).
    Returns a dict consumed by deepnet_forward.
    """
    L = len(params)
    dims = [int(in_dim)] + [int(w.shape[1]) for (w, _, _, _) in params]
    Dpad = max(_round_up(d, 128) for d in dims)

    folded = []
    for (w, b, scale, shift) in params:
        folded.append([
            jnp.asarray(w, jnp.float32),
            jnp.asarray(b, jnp.float32).reshape(1, -1),
            jnp.asarray(scale, jnp.float32).reshape(1, -1),
            jnp.asarray(shift, jnp.float32).reshape(1, -1),
        ])

    # Fold BN(l) affine (r*scale + shift) into Linear(l+1):
    #   (r*scale + shift) @ W + b  ==  r @ (scale^T * W) + (shift @ W + b)
    # After this, only the LAST layer keeps an in-kernel affine.
    for l in range(L - 1):
        w_next, b_next = folded[l + 1][0], folded[l + 1][1]
        scale_l, shift_l = folded[l][2], folded[l][3]
        folded[l + 1][1] = b_next + shift_l @ w_next          # uses original W
        folded[l + 1][0] = w_next * scale_l.reshape(-1, 1)    # scale input rows

    # Zero-padded bf16 weight stack (zero padding keeps padded columns exactly 0).
    w_stack = jnp.stack([
        jnp.pad(w, ((0, Dpad - w.shape[0]), (0, Dpad - w.shape[1])))
        for (w, _, _, _) in folded
    ]).astype(jnp.bfloat16) if L else jnp.zeros((0, Dpad, Dpad), jnp.bfloat16)

    # Packed affine block: row 0 = bias, rows 1/2 = last-layer BN scale/shift.
    aff_stack = jnp.zeros((max(L, 1), 8, Dpad), jnp.float32)
    for l, (w, b, scale, shift) in enumerate(folded):
        dout = w.shape[1]
        aff_stack = aff_stack.at[l, 0, :dout].set(b[0])
        if l == L - 1:
            aff_stack = aff_stack.at[l, 1, :dout].set(scale[0])
            aff_stack = aff_stack.at[l, 2, :dout].set(shift[0])

    return dict(w_stack=w_stack, aff_stack=aff_stack, dims=tuple(dims), d_pad=Dpad)


# ---------------------------------------------------------------------------
# Kernels
# ---------------------------------------------------------------------------
def _make_resident_kernel(num_layers, use_scratch):
    """All layers statically unrolled; weight stack stays VMEM-resident."""

    def kernel(x_ref, w_ref, aff_ref, o_ref, *scratch):
        cur = x_ref[...]                                     # bf16 (TB, Dpad)
        for l in range(num_layers):                          # static unroll
            aff = aff_ref[l]                                 # (8, Dpad) f32
            y = jnp.dot(cur, w_ref[l], preferred_element_type=jnp.float32)
            y = jnp.maximum(y + aff[0:1, :], 0.0)            # Linear bias + ReLU
            if l == num_layers - 1:
                # Only the last layer applies its (eval-mode) BN affine; the
                # others were folded into the following layer's weights/bias.
                # Dropout (eval mode) == identity.
                o_ref[...] = (y * aff[1:2, :] + aff[2:3, :]).astype(o_ref.dtype)
            elif use_scratch:
                buf = scratch[l % 2]
                buf[...] = y.astype(buf.dtype)               # bf16 write-through
                cur = buf[...]
            else:
                cur = y.astype(jnp.bfloat16)                 # stays vreg-resident

    return kernel


def _streaming_kernel(x_ref, w_ref, aff_ref, o_ref, act_ref):
    """Weights streamed one layer per grid step; activation tile resident in VMEM."""
    l = pl.program_id(1)
    last = pl.num_programs(1) - 1

    @pl.when(l == 0)
    def _():
        act_ref[...] = x_ref[...]

    aff = aff_ref[0]                                         # (8, Dpad)
    y = jnp.dot(act_ref[...], w_ref[0], preferred_element_type=jnp.float32)
    y = jnp.maximum(y + aff[0:1, :], 0.0)

    @pl.when(l == last)
    def _():
        o_ref[...] = (y * aff[1:2, :] + aff[2:3, :]).astype(o_ref.dtype)

    @pl.when(l < last)
    def _():
        act_ref[...] = y.astype(act_ref.dtype)


# ---------------------------------------------------------------------------
# Forward wrapper
# ---------------------------------------------------------------------------
def _vmem_capacity_bytes():
    try:
        return int(pltpu.get_tpu_info().vmem_capacity_bytes)
    except Exception:
        return 64 * 1024 * 1024          # conservative fallback (v7x per-TC)


def _choose_batch_tiling(B, batch_tile):
    Bp8 = _round_up(max(B, 8), 8)
    n_tiles = max(1, _cdiv(Bp8, batch_tile))
    if n_tiles < 2 and Bp8 >= 16:
        n_tiles = 2                      # keep both TensorCores busy (v7x megacore)
    TB = _round_up(_cdiv(Bp8, n_tiles), 8)
    return TB, TB * n_tiles, n_tiles


def deepnet_forward(x, packed, *, batch_tile=512, force_streaming=False):
    """Run the whole DeepNet MLP as a single fused Pallas kernel."""
    w_stack, aff_stack = packed["w_stack"], packed["aff_stack"]
    dims, Dpad = packed["dims"], packed["d_pad"]
    L = int(w_stack.shape[0])
    B, D0 = x.shape
    assert D0 == dims[0], f"input dim {D0} != packed dim {dims[0]}"
    if L == 0:
        return x

    TB, Bp, n_tiles = _choose_batch_tiling(B, batch_tile)

    # Pad once (zero feature / batch padding); activations travel as bf16.
    xp = jnp.zeros((Bp, Dpad), jnp.bfloat16).at[:B, :D0].set(x.astype(jnp.bfloat16))

    act_bytes = TB * Dpad * 2
    out_bytes = TB * Dpad * 4
    w_bytes = L * Dpad * Dpad * 2
    aff_bytes = L * 8 * Dpad * 4
    cap = _vmem_capacity_bytes()
    budget = int(cap * 0.85)             # ~15% headroom for compiler scratch

    use_scratch = (act_bytes > 96 * 1024) and (L > 1)
    # Conservative: assume every pipelined operand is double-buffered.
    resident_need = (2 * act_bytes + 2 * out_bytes + 2 * w_bytes + 2 * aff_bytes
                     + (2 * act_bytes if use_scratch else 0))
    use_streaming = force_streaming or (resident_need > budget)

    if not use_streaming:
        kernel = _make_resident_kernel(L, use_scratch)
        scratch = ([pltpu.VMEM((TB, Dpad), jnp.bfloat16)] * 2) if use_scratch else []
        out = pl.pallas_call(
            kernel,
            out_shape=jax.ShapeDtypeStruct((Bp, Dpad), jnp.float32),
            grid=(n_tiles,),
            in_specs=[
                pl.BlockSpec((TB, Dpad), lambda i: (i, 0)),            # x: batch-tiled
                pl.BlockSpec((L, Dpad, Dpad), lambda i: (0, 0, 0)),    # weights: resident
                pl.BlockSpec((L, 8, Dpad), lambda i: (0, 0, 0)),       # bias/affine: resident
            ],
            out_specs=pl.BlockSpec((TB, Dpad), lambda i: (i, 0)),
            scratch_shapes=scratch,
            compiler_params=pltpu.CompilerParams(
                dimension_semantics=("parallel",),
                vmem_limit_bytes=min(max(int(resident_need * 1.4), 16 << 20),
                                     int(cap * 0.9)),
            ),
        )(xp, w_stack, aff_stack)
    else:
        # Weight-streaming fallback (e.g. v7x 64 MiB/TC): one layer of weights
        # per grid step, prefetched/double-buffered by the pipeline, while the
        # activation tile stays resident in VMEM scratch across the layer axis.
        streaming_need = (2 * act_bytes + 2 * out_bytes
                          + 2 * Dpad * Dpad * 2 + 2 * 8 * Dpad * 4 + act_bytes)
        out = pl.pallas_call(
            _streaming_kernel,
            out_shape=jax.ShapeDtypeStruct((Bp, Dpad), jnp.float32),
            grid=(n_tiles, L),
            in_specs=[
                pl.BlockSpec((TB, Dpad), lambda i, l: (i, 0)),         # x: per batch tile
                pl.BlockSpec((1, Dpad, Dpad), lambda i, l: (l, 0, 0)), # weights: streamed
                pl.BlockSpec((1, 8, Dpad), lambda i, l: (l, 0, 0)),    # affine: streamed
            ],
            out_specs=pl.BlockSpec((TB, Dpad), lambda i, l: (i, 0)),
            scratch_shapes=[pltpu.VMEM((TB, Dpad), jnp.bfloat16)],
            compiler_params=pltpu.CompilerParams(
                dimension_semantics=("parallel", "arbitrary"),
                vmem_limit_bytes=min(max(int(streaming_need * 1.4), 16 << 20),
                                     int(cap * 0.9)),
            ),
        )(xp, w_stack, aff_stack)

    return out[:B, :dims[-1]]


# ---------------------------------------------------------------------------
# Init + pure-JAX reference
# ---------------------------------------------------------------------------
def init_deepnet_params(key, hidden_dims):
    """nn.Linear default init + BatchNorm1d with (pretend-trained) running stats
    pre-folded into per-feature eval-mode scale/shift (non-trivial so the
    affine / folding paths are actually exercised)."""
    params = []
    eps = 1e-5
    for i in range(len(hidden_dims) - 1):
        din, dout = hidden_dims[i], hidden_dims[i + 1]
        key, kw, kb, kg, kbe, km, kv = jax.random.split(key, 7)
        bound = 1.0 / float(jnp.sqrt(din))
        w = jax.random.uniform(kw, (din, dout), jnp.float32, -bound, bound)
        b = jax.random.uniform(kb, (1, dout), jnp.float32, -bound, bound)
        gamma = jax.random.uniform(kg, (1, dout), jnp.float32, 0.5, 1.5)
        beta = 0.1 * jax.random.normal(kbe, (1, dout), jnp.float32)
        running_mean = 0.1 * jax.random.normal(km, (1, dout), jnp.float32)
        running_var = jax.random.uniform(kv, (1, dout), jnp.float32, 0.5, 1.5)
        scale = gamma / jnp.sqrt(running_var + eps)
        shift = beta - running_mean * scale
        params.append((w, b, scale, shift))
    return params


def deepnet_reference(x, params):
    """Pure f32 reference, original per-layer formulation (eval-mode BN/Dropout)."""
    for (w, b, scale, shift) in params:
        x = jnp.maximum(x @ w + b, 0.0) * scale + shift
    return x


if __name__ == "__main__":
    key = jax.random.PRNGKey(0)

    # --- small config (matches the module spec) ---------------------------
    hidden_dims = [32, 64, 32, 16]
    batch = 8
    key, kx, kp = jax.random.split(key, 3)
    x = jax.random.normal(kx, (batch, hidden_dims[0]), jnp.float32)
    params = init_deepnet_params(kp, hidden_dims)
    packed = pack_deepnet_params(params, hidden_dims[0])     # pack ONCE

    out = jax.block_until_ready(deepnet_forward(x, packed))
    ref = deepnet_reference(x, params)
    assert out.shape == (batch, hidden_dims[-1])
    assert jnp.allclose(out, ref, atol=5e-2, rtol=5e-2), \
        f"resident path max abs err {float(jnp.max(jnp.abs(out - ref)))}"

    # --- weight-streaming fallback path (same params, forced) -------------
    out_s = jax.block_until_ready(deepnet_forward(x, packed, force_streaming=True))
    assert jnp.allclose(out_s, ref, atol=5e-2, rtol=5e-2), \
        f"streaming path max abs err {float(jnp.max(jnp.abs(out_s - ref)))}"

    # --- larger config: multi batch tile + bf16 ping-pong scratch path ----
    hd2 = [256, 512, 512, 128]
    b2 = 1024
    key, kx2, kp2 = jax.random.split(key, 3)
    x2 = jax.random.normal(kx2, (b2, hd2[0]), jnp.float32)
    params2 = init_deepnet_params(kp2, hd2)
    packed2 = pack_deepnet_params(params2, hd2[0])
    out2 = jax.block_until_ready(deepnet_forward(x2, packed2))
    ref2 = deepnet_reference(x2, params2)
    assert out2.shape == (b2, hd2[-1])
    assert jnp.allclose(out2, ref2, atol=1e-1, rtol=5e-2), \
        f"large config max abs err {float(jnp.max(jnp.abs(out2 - ref2)))}"

    print("KERNEL_OK")
</pallas_src>

<mosaic_0001>
module attributes {stable_mosaic.version = 11 : i64} {
  func.func @kernel(%arg0: i32, %arg1: memref<8x128xbf16, #tpu.memory_space<vmem>>, %arg2: memref<3x128x128xbf16, #tpu.memory_space<vmem>>, %arg3: memref<3x8x128xf32, #tpu.memory_space<vmem>>, %arg4: memref<8x128xf32, #tpu.memory_space<vmem>>) attributes {dimension_semantics = [#tpu.dimension_semantics<parallel>], iteration_bounds = array<i64: 1>, scalar_prefetch = 0 : i64, scratch_operands = 0 : i64, tpu.core_type = #tpu.core_type<tc>, window_params = [{transform_indices = @transform_0, window_bounds = array<i64: 8, 128>}, {pipeline_mode = #tpu.pipeline_mode<synchronous>, transform_indices = @transform_1, window_bounds = array<i64: 3, 128, 128>}, {pipeline_mode = #tpu.pipeline_mode<synchronous>, transform_indices = @transform_2, window_bounds = array<i64: 3, 8, 128>}, {transform_indices = @transform_3, window_bounds = array<i64: 8, 128>}]} {
    %c0 = arith.constant 0 : index
    %c0_0 = arith.constant 0 : index
    %0 = vector.load %arg1[%c0, %c0_0] : memref<8x128xbf16, #tpu.memory_space<vmem>>, vector<8x128xbf16>
    %c0_1 = arith.constant 0 : index
    %c0_2 = arith.constant 0 : index
    %c0_3 = arith.constant 0 : index
    %1 = vector.load %arg3[%c0_1, %c0_2, %c0_3] : memref<3x8x128xf32, #tpu.memory_space<vmem>>, vector<1x8x128xf32>
    %2 = vector.shape_cast %1 : vector<1x8x128xf32> to vector<8x128xf32>
    %c0_4 = arith.constant 0 : index
    %c0_5 = arith.constant 0 : index
    %c0_6 = arith.constant 0 : index
    %3 = vector.load %arg2[%c0_4, %c0_5, %c0_6] : memref<3x128x128xbf16, #tpu.memory_space<vmem>>, vector<1x128x128xbf16>
    %4 = vector.shape_cast %3 : vector<1x128x128xbf16> to vector<128x128xbf16>
    %cst = arith.constant dense<0.000000e+00> : vector<8x128xf32>
    %5 = tpu.matmul %0, %4, %cst {dimension_numbers = #tpu.dot_dimension_numbers<[1], [0], [0], [1], [0, 0, 1, 1], [], []>} : vector<8x128xbf16>, vector<128x128xbf16>, vector<8x128xf32> -> vector<8x128xf32>
    %6 = vector.extract_strided_slice %2 {offsets = [0, 0], sizes = [1, 128], strides = [1, 1]} : vector<8x128xf32> to vector<1x128xf32>
    %7 = vector.broadcast %6 : vector<1x128xf32> to vector<8x128xf32>
    %8 = arith.addf %5, %7 : vector<8x128xf32>
    %cst_7 = arith.constant 0.000000e+00 : f32
    %9 = vector.broadcast %cst_7 : f32 to vector<8x128xf32>
    %10 = arith.maximumf %8, %9 : vector<8x128xf32>
    %11 = arith.truncf %10 : vector<8x128xf32> to vector<8x128xbf16>
    %c1 = arith.constant 1 : index
    %c0_8 = arith.constant 0 : index
    %c0_9 = arith.constant 0 : index
    %12 = vector.load %arg3[%c1, %c0_8, %c0_9] : memref<3x8x128xf32, #tpu.memory_space<vmem>>, vector<1x8x128xf32>
    %13 = vector.shape_cast %12 : vector<1x8x128xf32> to vector<8x128xf32>
    %c1_10 = arith.constant 1 : index
    %c0_11 = arith.constant 0 : index
    %c0_12 = arith.constant 0 : index
    %14 = vector.load %arg2[%c1_10, %c0_11, %c0_12] : memref<3x128x128xbf16, #tpu.memory_space<vmem>>, vector<1x128x128xbf16>
    %15 = vector.shape_cast %14 : vector<1x128x128xbf16> to vector<128x128xbf16>
    %cst_13 = arith.constant dense<0.000000e+00> : vector<8x128xf32>
    %16 = tpu.matmul %11, %15, %cst_13 {dimension_numbers = #tpu.dot_dimension_numbers<[1], [0], [0], [1], [0, 0, 1, 1], [], []>} : vector<8x128xbf16>, vector<128x128xbf16>, vector<8x128xf32> -> vector<8x128xf32>
    %17 = vector.extract_strided_slice %13 {offsets = [0, 0], sizes = [1, 128], strides = [1, 1]} : vector<8x128xf32> to vector<1x128xf32>
    %18 = vector.broadcast %17 : vector<1x128xf32> to vector<8x128xf32>
    %19 = arith.addf %16, %18 : vector<8x128xf32>
    %cst_14 = arith.constant 0.000000e+00 : f32
    %20 = vector.broadcast %cst_14 : f32 to vector<8x128xf32>
    %21 = arith.maximumf %19, %20 : vector<8x128xf32>
    %22 = arith.truncf %21 : vector<8x128xf32> to vector<8x128xbf16>
    %c2 = arith.constant 2 : index
    %c0_15 = arith.constant 0 : index
    %c0_16 = arith.constant 0 : index
    %23 = vector.load %arg3[%c2, %c0_15, %c0_16] : memref<3x8x128xf32, #tpu.memory_space<vmem>>, vector<1x8x128xf32>
    %24 = vector.shape_cast %23 : vector<1x8x128xf32> to vector<8x128xf32>
    %c2_17 = arith.constant 2 : index
    %c0_18 = arith.constant 0 : index
    %c0_19 = arith.constant 0 : index
    %25 = vector.load %arg2[%c2_17, %c0_18, %c0_19] : memref<3x128x128xbf16, #tpu.memory_space<vmem>>, vector<1x128x128xbf16>
    %26 = vector.shape_cast %25 : vector<1x128x128xbf16> to vector<128x128xbf16>
    %cst_20 = arith.constant dense<0.000000e+00> : vector<8x128xf32>
    %27 = tpu.matmul %22, %26, %cst_20 {dimension_numbers = #tpu.dot_dimension_numbers<[1], [0], [0], [1], [0, 0, 1, 1], [], []>} : vector<8x128xbf16>, vector<128x128xbf16>, vector<8x128xf32> -> vector<8x128xf32>
    %28 = vector.extract_strided_slice %24 {offsets = [0, 0], sizes = [1, 128], strides = [1, 1]} : vector<8x128xf32> to vector<1x128xf32>
    %29 = vector.broadcast %28 : vector<1x128xf32> to vector<8x128xf32>
    %30 = arith.addf %27, %29 : vector<8x128xf32>
    %cst_21 = arith.constant 0.000000e+00 : f32
    %31 = vector.broadcast %cst_21 : f32 to vector<8x128xf32>
    %32 = arith.maximumf %30, %31 : vector<8x128xf32>
    %33 = vector.extract_strided_slice %24 {offsets = [1, 0], sizes = [1, 128], strides = [1, 1]} : vector<8x128xf32> to vector<1x128xf32>
    %34 = vector.broadcast %33 : vector<1x128xf32> to vector<8x128xf32>
    %35 = arith.mulf %32, %34 : vector<8x128xf32>
    %36 = vector.extract_strided_slice %24 {offsets = [2, 0], sizes = [1, 128], strides = [1, 1]} : vector<8x128xf32> to vector<1x128xf32>
    %37 = vector.broadcast %36 : vector<1x128xf32> to vector<8x128xf32>
    %38 = arith.addf %35, %37 : vector<8x128xf32>
    %c0_22 = arith.constant 0 : index
    %c0_23 = arith.constant 0 : index
    %39 = vector.load %arg4[%c0_22, %c0_23] : memref<8x128xf32, #tpu.memory_space<vmem>>, vector<8x128xf32>
    tpu.vector_store %arg4[%c0_22, %c0_23], %38 {strides = array<i32>} : memref<8x128xf32, #tpu.memory_space<vmem>>, vector<8x128xf32>,
    return
  }
  func.func @transform_0(%arg0: i32) -> (i32, i32) {
    %c0_i32 = arith.constant 0 : i32
    %c0_i32_0 = arith.constant 0 : i32
    return %arg0, %c0_i32 : i32, i32
  }
  func.func @transform_1(%arg0: i32) -> (i32, i32, i32) {
    %c0_i32 = arith.constant 0 : i32
    %c0_i32_0 = arith.constant 0 : i32
    %c0_i32_1 = arith.constant 0 : i32
    %c0_i32_2 = arith.constant 0 : i32
    return %c0_i32, %c0_i32_0, %c0_i32_1 : i32, i32, i32
  }
  func.func @transform_2(%arg0: i32) -> (i32, i32, i32) {
    %c0_i32 = arith.constant 0 : i32
    %c0_i32_0 = arith.constant 0 : i32
    %c0_i32_1 = arith.constant 0 : i32
    %c0_i32_2 = arith.constant 0 : i32
    return %c0_i32, %c0_i32_0, %c0_i32_1 : i32, i32, i32
  }
  func.func @transform_3(%arg0: i32) -> (i32, i32) {
    %c0_i32 = arith.constant 0 : i32
    %c0_i32_0 = arith.constant 0 : i32
    return %arg0, %c0_i32 : i32, i32
  }
}

</mosaic_0001>

<bundles_post_ra>
// kernel: tpu_custom_call.1
= control target key start
LH: loop header
LB: loop body
LE: loop exit
PB: predicated region body
PF: predicated region fallthrough
CT: control target
= control target key end

     0   :  { %8 = vsyncpa [#allocation3], 0  ;;  %s600_s0 = inlined_call_operand.hbm [shape: bf16[8,128], index: 0, kind: input, shape index: {}]   ;;  %s601_s1 = inlined_call_operand.hbm [shape: bf16[3,128,128], index: 1, kind: input, shape index: {}]   ;;  %s602_s2 = inlined_call_operand.hbm [shape: f32[3,8,128], index: 2, kind: input, shape index: {}]   ;;  %s603_s3 = inlined_call_operand.hbm [shape: f32[8,128], index: 3, kind: output, shape index: {}]  }
   0x1   :  { %9 = vsyncpa [#allocation6], 0  ;;  %s26_s14 = sshll.u32 %s601_s1, 4  ;;  %s27_s14 = int_to_ptr.hbm [resolvable:$true] %s26_s14 }
   0x2   :  { %10 = vsyncpa [#allocation4], 0  ;;  %s560_s15 = smov [#allocation5]   ;;  %s16_s19 = sshll.u32 %s600_s0, 4  ;;  %s17_s19 = int_to_ptr.hbm [resolvable:$true] %s16_s19 }
   0x3   :  { %s28_s16 = sshll.u32 %s560_s15, 4  ;;  %s561_s20 = smov 64   ;;  %s29_s16 = int_to_ptr.vmem [resolvable:$true] %s28_s16 }
   0x4   :  { %s562_s21 = smov 4   ;;  %s563_s22 = smov [#allocation2]  }
   0x5   :  { %34 = dma.hbm_to_vmem [thread:$0]  %s27_s14, 3072, %s29_s16, [#allocation6], %s561_s20, %s561_s20, %s562_s21  }
   0x6   :  { %s18_s23 = sshll.u32 %s563_s22, 4  ;;  %s39_s26 = sshll.u32 %s602_s2, 4  ;;  %s19_s23 = int_to_ptr.vmem [resolvable:$true] %s18_s23  ;;  %s40_s26 = int_to_ptr.hbm [resolvable:$true] %s39_s26 }
   0x7   :  { %21 = dma.hbm_to_vmem [thread:$0]  %s17_s19, 64, %s19_s23, [#allocation3]  }
   0x8   :  { %s564_s1 = smov [#allocation7]   ;;  %s565_s28 = smov 128  }
   0x9   :  { %s41_s27 = sshll.u32 %s564_s1, 4  ;;  %s566_s29 = smov 8   ;;  %s42_s27 = int_to_ptr.vmem [resolvable:$true] %s41_s27 }
   0xa   :  { %47 = dma.hbm_to_vmem [thread:$0]  %s40_s26, 384, %s42_s27, [#allocation6], %s565_s28, %s565_s28, %s566_s29  }
   0xb   :  { %554 = dma.done.wait [#allocation3], 64  }
   0xc   :  { %555 = vsyncadd [#allocation3], 4294967232 }
   0xd   :  { %556 = dma.done.wait [#allocation6], 3456  }
   0xe   :  { %557 = vsyncadd [#allocation6], 4294963840  ;;  %v433_v0 = vld [vmem:[#allocation5 + $0x38] sm:$0xff]  ;;  %v432_v1 = vld [vmem:[#allocation5 + $0x30] sm:$0xff]  ;;  %s567_s0 = smov [#allocation8]   ;;  %s319_s5 = sshll.u32 %s603_s3, 4  ;;  %s320_s5 = int_to_ptr.hbm [resolvable:$true] %s319_s5 }
   0xf   :  { %127 = vmatpush.bf16.msra.mxu0 %v433_v0  ;;  %v441_v2 = vld [vmem:[#allocation5 + $0x78] sm:$0xff]  ;;  %v440_v3 = vld [vmem:[#allocation5 + $0x70] sm:$0xff]  ;;  %v431_v4 = vld [vmem:[#allocation5 + $0x28] sm:$0xff]  ;;  %s317_s2 = sshll.u32 %s567_s0, 4  ;;  %s318_s2 = int_to_ptr.vmem [resolvable:$true] %s317_s2 }
  0x10   :  { %210 = vmatpush.bf16.msra.mxu1 %v441_v2  ;;  %v439_v5 = vld [vmem:[#allocation5 + $0x68] sm:$0xff]  ;;  %v430_v6 = vld [vmem:[#allocation5 + $0x20] sm:$0xff]  ;;  %v429_v8 = vld [vmem:[#allocation5 + $0x18] sm:$0xff] }
  0x11   :  { %v438_v7 = vld [vmem:[#allocation5 + $0x60] sm:$0xff]  ;;  %v437_v9 = vld [vmem:[#allocation5 + $0x58] sm:$0xff]  ;;  %v428_v10 = vld [vmem:[#allocation5 + $0x10] sm:$0xff] }
  0x12   :  { %v436_v11 = vld [vmem:[#allocation5 + $0x50] sm:$0xff]  ;;  %v427_v12 = vld [vmem:[#allocation5 + $0x8] sm:$0xff]  ;;  %v426_v13 = vld [vmem:[#allocation5] sm:$0xff] }
  0x13   :  { %128 = vmatpush.bf16.msra.mxu0 %v432_v1  ;;  %v60_v14 = vld [vmem:[#allocation2] sm:$0xf]  ;;  %v435_v15 = vld [vmem:[#allocation5 + $0x48] sm:$0xff]  ;;  %v434_v16 = vld [vmem:[#allocation5 + $0x40] sm:$0xff] }
  0x14   :  { %211 = vmatpush.bf16.msra.mxu1 %v440_v3  ;;  %v449_v17 = vld [vmem:[#allocation5 + $0xb8] sm:$0xff]  ;;  %v448_v18 = vld [vmem:[#allocation5 + $0xb0] sm:$0xff]  ;;  %v447_v19 = vld [vmem:[#allocation5 + $0xa8] sm:$0xff] }
  0x15   :  { %293 = vmatpush.bf16.msra.mxu2 %v449_v17  ;;  %v446_v20 = vld [vmem:[#allocation5 + $0xa0] sm:$0xff]  ;;  %v445_v21 = vld [vmem:[#allocation5 + $0x98] sm:$0xff]  ;;  %v444_v23 = vld [vmem:[#allocation5 + $0x90] sm:$0xff] }
  0x16   :  { %v61_v22 = vld [vmem:[#allocation7] sm:$0xff]  ;;  %v443_v30 = vld [vmem:[#allocation5 + $0x88] sm:$0xff]  ;;  %v226_v39 = vld [vmem:[#allocation7 + $0x10] sm:$0xff] }
  0x17   :  { %129 = vmatpush.bf16.msra.mxu0 %v431_v4  ;;  %v78_v24 = vperm.slane %v61_v22, 0  ;;  %v442_v31 = vld [vmem:[#allocation5 + $0x80] sm:$0xff]  ;;  %v143_v32 = vld [vmem:[#allocation7 + $0x8] sm:$0xff]  ;;  %v244_v40 = vperm.slane %v226_v39, 0  ;;  %v307_v43 = vperm.slane %v226_v39, 1  ;;  %v309_v45 = vperm.slane %v226_v39, 2 }
  0x18   :  { %212 = vmatpush.bf16.msra.mxu1 %v439_v5  ;;  %v161_v33 = vperm.slane %v143_v32, 0 }
  0x19   :  { %294 = vmatpush.bf16.msra.mxu2 %v448_v18 }
  0x1b   :  { %130 = vmatpush.bf16.msra.mxu0 %v430_v6 }
  0x1c   :  { %213 = vmatpush.bf16.msra.mxu1 %v438_v7 }
  0x1d   :  { %295 = vmatpush.bf16.msra.mxu2 %v447_v19 }
  0x1f   :  { %131 = vmatpush.bf16.msra.mxu0 %v429_v8 }
  0x20   :  { %214 = vmatpush.bf16.msra.mxu1 %v437_v9 }
  0x21   :  { %296 = vmatpush.bf16.msra.mxu2 %v446_v20 }
  0x23   :  { %132 = vmatpush.bf16.msra.mxu0 %v428_v10 }
  0x24   :  { %215 = vmatpush.bf16.msra.mxu1 %v436_v11 }
  0x25   :  { %297 = vmatpush.bf16.msra.mxu2 %v445_v21 }
  0x27   :  { %133 = vmatpush.bf16.msra.mxu0 %v427_v12 }
  0x28   :  { %216 = vmatpush.bf16.msra.mxu1 %v435_v15 }
  0x29   :  { %298 = vmatpush.bf16.msra.mxu2 %v444_v23 }
  0x2b   :  { %134 = vmatpush.bf16.msra.mxu0 %v426_v13 }
  0x2c   :  { %217 = vmatpush.bf16.msra.mxu1 %v434_v16 }
  0x2d   :  { %299 = vmatpush.bf16.msra.mxu2 %v443_v30 }
  0x2e   :  { %135 = vmatmul.bf16.vlgmr.msra.gmra.mxu0 %v60_v14 }
  0x31   :  { %300 = vmatpush.bf16.msra.mxu2 %v442_v31 }
  0xab   :  { %v136_v25 = vpop.f32.mrf.mxu0 }
  0xac   :  { %v137_v26 = vadd.f32 %v136_v25, %v78_v24 }
  0xae   :  { %v140_v27 = vmax.f32 %v137_v26, 0.0 }
  0xb0   :  { %v141_v28 = vpack.c.bf16 %v140_v27, %v140_v27 }
  0xb2   :  { %218 = vmatmul.bf16.vlgmr.msra.gmra.mxu1 %v141_v28 }
  0xb3   :  { %v138_v29 = vpop.f32.mrf.mxu0 }
 0x12f   :  { %v219_v34 = vpop.f32.mrf.mxu1 }
 0x130   :  { %v220_v35 = vadd.f32 %v219_v34, %v161_v33 }
 0x132   :  { %v223_v36 = vmax.f32 %v220_v35, 0.0 }
 0x134   :  { %v224_v37 = vpack.c.bf16 %v223_v36, %v223_v36 }
 0x136   :  { %301 = vmatmul.bf16.vlgmr.msra.gmra.mxu2 %v224_v37 }
 0x137   :  { %v221_v38 = vpop.f32.mrf.mxu1 }
 0x1b9   :  { %v302_v41 = vpop.f32.mrf.mxu2 }
 0x1ba   :  { %v303_v42 = vadd.f32 %v302_v41, %v244_v40 }
 0x1bc   :  { %v306_v44 = vmax.f32 %v303_v42, 0.0 }
 0x1be   :  { %v308_v46 = vmul.f32 %v307_v43, %v306_v44 }
 0x1c0   :  { %v310_v47 = vadd.f32 %v309_v45, %v308_v46 }
 0x1c1   :  { %v304_v48 = vpop.f32.mrf.mxu2 }
 0x1c2   :  { %311 = vst [vmem:[#allocation8] sm:$0xff] %v310_v47 }
 0x1c3   :  { %322 = dma.vmem_to_hbm [thread:$0]  %s318_s2, 128, %s320_s5, [#allocation4]  }
 0x1c4   :  { %558 = dma.done.wait [#allocation4], 128  }
 0x1c5   :  { %559 = vsyncadd [#allocation4], 4294967168 }
 0x1c6   :  { %327 = vsyncpa [#allocation3], 1 }
 0x1c7   :  { %328 = vsyncpa [#allocation6], 1 }
 0x1c8   :  { %329 = vsyncpa [#allocation4], 1 }

</bundles_post_ra>
